<compile_context>
chip_gen: v5e
topology: v5e:2x2
jax: 0.10.0
libtpu: 0.0.40
codegen_flags: <defaults>
</compile_context>

<pallas_src>
import functools

import jax
import jax.numpy as jnp
from jax.experimental import pallas as pl
from jax.experimental.pallas import tpu as pltpu


def rnn_chunk_kernel(xp_ref, whh_ref, wfc_ref, bfc_ref, out_ref, h_scratch,
                     *, t_chunk, t_total):
    """One time-chunk of the recurrence for one batch block.

    xp_ref : (Tc, Bb, H)  f32   precomputed x @ W_ih + b (bias folded in)
    whh_ref: (H, H)       bf16  hidden-to-hidden weight (resident across chunks)
    wfc_ref: (H, O)       bf16  final Linear weight (resident across chunks)
    bfc_ref: (1, O)       f32   final Linear bias
    out_ref: (Bb, O)      f32   written only at the last time-chunk
    h_scratch: (Bb, H)    f32   hidden state carried across time-chunks
    """
    c = pl.program_id(1)                       # time-chunk index (serial axis)

    @pl.when(c == 0)
    def _():
        h_scratch[...] = jnp.zeros_like(h_scratch)

    whh = whh_ref[...]                          # load once per chunk, reused in the loop
    h0 = h_scratch[...]

    def step(i, h):
        xp_i = xp_ref[i]                        # (Bb, H) f32, bias already included
        h_new = jnp.tanh(
            xp_i + jnp.dot(h.astype(whh.dtype), whh,
                           preferred_element_type=jnp.float32))
        if t_total % t_chunk != 0:              # static: mask only if the tail is padded
            valid = (c * t_chunk + i) < t_total
            h_new = jnp.where(valid, h_new, h)
        return h_new

    h = jax.lax.fori_loop(0, t_chunk, step, h0, unroll=True)
    h_scratch[...] = h

    @pl.when(c == pl.num_programs(1) - 1)
    def _():
        out_ref[...] = (
            jnp.dot(h.astype(wfc_ref.dtype), wfc_ref[...],
                    preferred_element_type=jnp.float32)
            + bfc_ref[...])


def _round_up(v, m):
    return (v + m - 1) // m * m


def rnn_forward(text, emb_table, w_ih, w_hh, b_rnn, w_fc, b_fc, *,
                weight_dtype=jnp.bfloat16, t_chunk=None):
    """text: (T, B) int32 token ids.  Returns (B, output_dim) float32.

    Parameter layout (already transposed relative to PyTorch storage):
      emb_table: (V, E)   w_ih: (E, H)   w_hh: (H, H)   b_rnn: (1, H) = b_ih + b_hh
      w_fc: (H, O)        b_fc: (1, O)
    """
    T, B = text.shape
    H = w_hh.shape[0]
    O = w_fc.shape[1]

    # ---- XLA glue: embedding gather + hoisted, time-independent input projection ----
    x = emb_table[text].astype(jnp.float32)                    # (T, B, E)
    xp = jnp.einsum("tbe,eh->tbh", x, w_ih) + b_rnn            # (T, B, H), bias folded in

    # ---- pad to vreg/MXU-friendly shapes (math-preserving: zero pads, tanh(0)=0) ----
    H_pad = _round_up(H, 128)                                  # lane axis
    O_pad = _round_up(O, 128)                                  # lane-dense output slab
    B_pad = _round_up(B, 8)                                    # f32 sublane
    Bb = B_pad if B_pad <= 256 else 256                        # batch block ("parallel" axis)
    B_pad = _round_up(B_pad, Bb)
    if t_chunk is None:
        # Timesteps per grid step; sized to keep the xp chunk + resident weights well
        # under the scoped VMEM budget even on v7x (64 MiB physical / 32 MiB default).
        t_chunk = min(T, 64)
    T_pad = _round_up(T, t_chunk)

    xp_p = jnp.zeros((T_pad, B_pad, H_pad), jnp.float32).at[:T, :B, :H].set(xp)
    whh_p = (jnp.zeros((H_pad, H_pad), jnp.float32).at[:H, :H].set(w_hh)
             .astype(weight_dtype))
    wfc_p = (jnp.zeros((H_pad, O_pad), jnp.float32).at[:H, :O].set(w_fc)
             .astype(weight_dtype))
    bfc_p = jnp.zeros((1, O_pad), jnp.float32).at[:, :O].set(b_fc)

    n_bblocks = B_pad // Bb
    n_chunks = T_pad // t_chunk

    kernel = functools.partial(rnn_chunk_kernel, t_chunk=t_chunk, t_total=T)

    out = pl.pallas_call(
        kernel,
        out_shape=jax.ShapeDtypeStruct((B_pad, O_pad), jnp.float32),
        grid_spec=pltpu.PrefetchScalarGridSpec(
            num_scalar_prefetch=0,
            grid=(n_bblocks, n_chunks),
            in_specs=[
                pl.BlockSpec((t_chunk, Bb, H_pad), lambda b, c: (c, b, 0)),  # xp chunk
                pl.BlockSpec((H_pad, H_pad), lambda b, c: (0, 0)),           # W_hh (resident)
                pl.BlockSpec((H_pad, O_pad), lambda b, c: (0, 0)),           # W_fc (resident)
                pl.BlockSpec((1, O_pad), lambda b, c: (0, 0)),               # fc bias
            ],
            out_specs=pl.BlockSpec((Bb, O_pad), lambda b, c: (b, 0)),        # lane-dense out
            scratch_shapes=[pltpu.VMEM((Bb, H_pad), jnp.float32)],           # hidden state
        ),
        compiler_params=pltpu.CompilerParams(
            # Time axis is inherently serial; the batch-block axis can shard across
            # v7x's two TensorCores (no effect on single-TC v5e/v6e).
            dimension_semantics=("parallel", "arbitrary"),
        ),
    )(xp_p, whh_p, wfc_p, bfc_p)

    return out[:B, :O]


def reference_forward(text, emb_table, w_ih, w_hh, b_rnn, w_fc, b_fc):
    """Pure-JAX f32 reference mirroring PyTorch nn.RNN semantics."""
    x = emb_table[text].astype(jnp.float32)     # (T, B, E)
    B = text.shape[1]
    H = w_hh.shape[0]

    def step(h, x_t):
        h_new = jnp.tanh(x_t @ w_ih + h @ w_hh + b_rnn)
        return h_new, h_new

    h0 = jnp.zeros((B, H), jnp.float32)
    h_last, _ = jax.lax.scan(step, h0, x)
    return h_last @ w_fc + b_fc


if __name__ == "__main__":
    # Small, TPU-friendly sizes.
    vocab_size = 50
    embedding_dim = 32
    hidden_dim = 32
    output_dim = 8
    seq_len = 8
    batch = 2

    key = jax.random.PRNGKey(0)
    k_emb, k_ih, k_hh, k_bih, k_bhh, k_fcw, k_fcb, k_txt = jax.random.split(key, 8)

    emb_table = jax.random.normal(k_emb, (vocab_size, embedding_dim), jnp.float32) * 0.1
    # PyTorch stores W_ih as (H, E) and applies x @ W_ih^T; we store the transposed (E, H).
    w_ih = jax.random.normal(k_ih, (embedding_dim, hidden_dim), jnp.float32) * 0.1
    w_hh = jax.random.normal(k_hh, (hidden_dim, hidden_dim), jnp.float32) * 0.1
    b_ih = jax.random.normal(k_bih, (hidden_dim,), jnp.float32) * 0.1
    b_hh = jax.random.normal(k_bhh, (hidden_dim,), jnp.float32) * 0.1
    b_rnn = (b_ih + b_hh).reshape(1, hidden_dim)
    w_fc = jax.random.normal(k_fcw, (hidden_dim, output_dim), jnp.float32) * 0.1
    b_fc = jax.random.normal(k_fcb, (output_dim,), jnp.float32).reshape(1, output_dim) * 0.1

    text = jax.random.randint(k_txt, (seq_len, batch), 0, vocab_size, jnp.int32)

    out = rnn_forward(text, emb_table, w_ih, w_hh, b_rnn, w_fc, b_fc)
    out = jax.block_until_ready(out)

    ref = reference_forward(text, emb_table, w_ih, w_hh, b_rnn, w_fc, b_fc)
    ref = jax.block_until_ready(ref)

    assert out.shape == (batch, output_dim)
    assert jnp.allclose(out, ref, rtol=2e-2, atol=2e-2), (out, ref)

    print("KERNEL_OK")
</pallas_src>

<mosaic_0001>
module attributes {stable_mosaic.version = 11 : i64} {
  func.func @rnn_chunk_kernel(%arg0: i32, %arg1: i32, %arg2: memref<8x8x128xf32, #tpu.memory_space<vmem>>, %arg3: memref<128x128xbf16, #tpu.memory_space<vmem>>, %arg4: memref<128x128xbf16, #tpu.memory_space<vmem>>, %arg5: memref<1x128xf32, #tpu.memory_space<vmem>>, %arg6: memref<8x128xf32, #tpu.memory_space<vmem>>, %arg7: memref<8x128xf32, #tpu.memory_space<vmem>>) attributes {dimension_semantics = [#tpu.dimension_semantics<parallel>, #tpu.dimension_semantics<arbitrary>], iteration_bounds = array<i64: 1, 1>, scalar_prefetch = 0 : i64, scratch_operands = 1 : i64, tpu.core_type = #tpu.core_type<tc>, window_params = [{transform_indices = @transform_0, window_bounds = array<i64: 8, 8, 128>}, {pipeline_mode = #tpu.pipeline_mode<synchronous>, transform_indices = @transform_1, window_bounds = array<i64: 128, 128>}, {pipeline_mode = #tpu.pipeline_mode<synchronous>, transform_indices = @transform_2, window_bounds = array<i64: 128, 128>}, {pipeline_mode = #tpu.pipeline_mode<synchronous>, transform_indices = @transform_3, window_bounds = array<i64: 1, 128>}, {transform_indices = @transform_4, window_bounds = array<i64: 8, 128>}]} {
    %c0_i32 = arith.constant 0 : i32
    %0 = arith.cmpi eq, %arg1, %c0_i32 : i32
    %1 = arith.extui %0 : i1 to i32
    %c0_i32_0 = arith.constant 0 : i32
    %2 = arith.cmpi ne, %1, %c0_i32_0 : i32
    scf.if %2 {
      %cst_32 = arith.constant 0.000000e+00 : f32
      %65 = vector.broadcast %cst_32 : f32 to vector<8x128xf32>
      %c0_33 = arith.constant 0 : index
      %c0_34 = arith.constant 0 : index
      %66 = vector.load %arg7[%c0_33, %c0_34] : memref<8x128xf32, #tpu.memory_space<vmem>>, vector<8x128xf32>
      tpu.vector_store %arg7[%c0_33, %c0_34], %65 {strides = array<i32>} : memref<8x128xf32, #tpu.memory_space<vmem>>, vector<8x128xf32>,
    } else {
    }
    %c0 = arith.constant 0 : index
    %c0_1 = arith.constant 0 : index
    %3 = vector.load %arg3[%c0, %c0_1] : memref<128x128xbf16, #tpu.memory_space<vmem>>, vector<128x128xbf16>
    %c0_2 = arith.constant 0 : index
    %c0_3 = arith.constant 0 : index
    %4 = vector.load %arg7[%c0_2, %c0_3] : memref<8x128xf32, #tpu.memory_space<vmem>>, vector<8x128xf32>
    %c0_i32_4 = arith.constant 0 : i32
    %5 = arith.index_cast %c0_i32_4 : i32 to index
    %c0_5 = arith.constant 0 : index
    %c0_6 = arith.constant 0 : index
    %6 = vector.load %arg2[%5, %c0_5, %c0_6] : memref<8x8x128xf32, #tpu.memory_space<vmem>>, vector<1x8x128xf32>
    %7 = vector.shape_cast %6 : vector<1x8x128xf32> to vector<8x128xf32>
    %8 = arith.truncf %4 : vector<8x128xf32> to vector<8x128xbf16>
    %cst = arith.constant dense<0.000000e+00> : vector<8x128xf32>
    %9 = tpu.matmul %8, %3, %cst {dimension_numbers = #tpu.dot_dimension_numbers<[1], [0], [0], [1], [0, 0, 1, 1], [], []>} : vector<8x128xbf16>, vector<128x128xbf16>, vector<8x128xf32> -> vector<8x128xf32>
    %10 = arith.addf %7, %9 : vector<8x128xf32>
    %11 = math.tanh %10 : vector<8x128xf32>
    %c1_i32 = arith.constant 1 : i32
    %12 = arith.index_cast %c1_i32 : i32 to index
    %c0_7 = arith.constant 0 : index
    %c0_8 = arith.constant 0 : index
    %13 = vector.load %arg2[%12, %c0_7, %c0_8] : memref<8x8x128xf32, #tpu.memory_space<vmem>>, vector<1x8x128xf32>
    %14 = vector.shape_cast %13 : vector<1x8x128xf32> to vector<8x128xf32>
    %15 = arith.truncf %11 : vector<8x128xf32> to vector<8x128xbf16>
    %cst_9 = arith.constant dense<0.000000e+00> : vector<8x128xf32>
    %16 = tpu.matmul %15, %3, %cst_9 {dimension_numbers = #tpu.dot_dimension_numbers<[1], [0], [0], [1], [0, 0, 1, 1], [], []>} : vector<8x128xbf16>, vector<128x128xbf16>, vector<8x128xf32> -> vector<8x128xf32>
    %17 = arith.addf %14, %16 : vector<8x128xf32>
    %18 = math.tanh %17 : vector<8x128xf32>
    %c2_i32 = arith.constant 2 : i32
    %19 = arith.index_cast %c2_i32 : i32 to index
    %c0_10 = arith.constant 0 : index
    %c0_11 = arith.constant 0 : index
    %20 = vector.load %arg2[%19, %c0_10, %c0_11] : memref<8x8x128xf32, #tpu.memory_space<vmem>>, vector<1x8x128xf32>
    %21 = vector.shape_cast %20 : vector<1x8x128xf32> to vector<8x128xf32>
    %22 = arith.truncf %18 : vector<8x128xf32> to vector<8x128xbf16>
    %cst_12 = arith.constant dense<0.000000e+00> : vector<8x128xf32>
    %23 = tpu.matmul %22, %3, %cst_12 {dimension_numbers = #tpu.dot_dimension_numbers<[1], [0], [0], [1], [0, 0, 1, 1], [], []>} : vector<8x128xbf16>, vector<128x128xbf16>, vector<8x128xf32> -> vector<8x128xf32>
    %24 = arith.addf %21, %23 : vector<8x128xf32>
    %25 = math.tanh %24 : vector<8x128xf32>
    %c3_i32 = arith.constant 3 : i32
    %26 = arith.index_cast %c3_i32 : i32 to index
    %c0_13 = arith.constant 0 : index
    %c0_14 = arith.constant 0 : index
    %27 = vector.load %arg2[%26, %c0_13, %c0_14] : memref<8x8x128xf32, #tpu.memory_space<vmem>>, vector<1x8x128xf32>
    %28 = vector.shape_cast %27 : vector<1x8x128xf32> to vector<8x128xf32>
    %29 = arith.truncf %25 : vector<8x128xf32> to vector<8x128xbf16>
    %cst_15 = arith.constant dense<0.000000e+00> : vector<8x128xf32>
    %30 = tpu.matmul %29, %3, %cst_15 {dimension_numbers = #tpu.dot_dimension_numbers<[1], [0], [0], [1], [0, 0, 1, 1], [], []>} : vector<8x128xbf16>, vector<128x128xbf16>, vector<8x128xf32> -> vector<8x128xf32>
    %31 = arith.addf %28, %30 : vector<8x128xf32>
    %32 = math.tanh %31 : vector<8x128xf32>
    %c4_i32 = arith.constant 4 : i32
    %33 = arith.index_cast %c4_i32 : i32 to index
    %c0_16 = arith.constant 0 : index
    %c0_17 = arith.constant 0 : index
    %34 = vector.load %arg2[%33, %c0_16, %c0_17] : memref<8x8x128xf32, #tpu.memory_space<vmem>>, vector<1x8x128xf32>
    %35 = vector.shape_cast %34 : vector<1x8x128xf32> to vector<8x128xf32>
    %36 = arith.truncf %32 : vector<8x128xf32> to vector<8x128xbf16>
    %cst_18 = arith.constant dense<0.000000e+00> : vector<8x128xf32>
    %37 = tpu.matmul %36, %3, %cst_18 {dimension_numbers = #tpu.dot_dimension_numbers<[1], [0], [0], [1], [0, 0, 1, 1], [], []>} : vector<8x128xbf16>, vector<128x128xbf16>, vector<8x128xf32> -> vector<8x128xf32>
    %38 = arith.addf %35, %37 : vector<8x128xf32>
    %39 = math.tanh %38 : vector<8x128xf32>
    %c5_i32 = arith.constant 5 : i32
    %40 = arith.index_cast %c5_i32 : i32 to index
    %c0_19 = arith.constant 0 : index
    %c0_20 = arith.constant 0 : index
    %41 = vector.load %arg2[%40, %c0_19, %c0_20] : memref<8x8x128xf32, #tpu.memory_space<vmem>>, vector<1x8x128xf32>
    %42 = vector.shape_cast %41 : vector<1x8x128xf32> to vector<8x128xf32>
    %43 = arith.truncf %39 : vector<8x128xf32> to vector<8x128xbf16>
    %cst_21 = arith.constant dense<0.000000e+00> : vector<8x128xf32>
    %44 = tpu.matmul %43, %3, %cst_21 {dimension_numbers = #tpu.dot_dimension_numbers<[1], [0], [0], [1], [0, 0, 1, 1], [], []>} : vector<8x128xbf16>, vector<128x128xbf16>, vector<8x128xf32> -> vector<8x128xf32>
    %45 = arith.addf %42, %44 : vector<8x128xf32>
    %46 = math.tanh %45 : vector<8x128xf32>
    %c6_i32 = arith.constant 6 : i32
    %47 = arith.index_cast %c6_i32 : i32 to index
    %c0_22 = arith.constant 0 : index
    %c0_23 = arith.constant 0 : index
    %48 = vector.load %arg2[%47, %c0_22, %c0_23] : memref<8x8x128xf32, #tpu.memory_space<vmem>>, vector<1x8x128xf32>
    %49 = vector.shape_cast %48 : vector<1x8x128xf32> to vector<8x128xf32>
    %50 = arith.truncf %46 : vector<8x128xf32> to vector<8x128xbf16>
    %cst_24 = arith.constant dense<0.000000e+00> : vector<8x128xf32>
    %51 = tpu.matmul %50, %3, %cst_24 {dimension_numbers = #tpu.dot_dimension_numbers<[1], [0], [0], [1], [0, 0, 1, 1], [], []>} : vector<8x128xbf16>, vector<128x128xbf16>, vector<8x128xf32> -> vector<8x128xf32>
    %52 = arith.addf %49, %51 : vector<8x128xf32>
    %53 = math.tanh %52 : vector<8x128xf32>
    %c7_i32 = arith.constant 7 : i32
    %54 = arith.index_cast %c7_i32 : i32 to index
    %c0_25 = arith.constant 0 : index
    %c0_26 = arith.constant 0 : index
    %55 = vector.load %arg2[%54, %c0_25, %c0_26] : memref<8x8x128xf32, #tpu.memory_space<vmem>>, vector<1x8x128xf32>
    %56 = vector.shape_cast %55 : vector<1x8x128xf32> to vector<8x128xf32>
    %57 = arith.truncf %53 : vector<8x128xf32> to vector<8x128xbf16>
    %cst_27 = arith.constant dense<0.000000e+00> : vector<8x128xf32>
    %58 = tpu.matmul %57, %3, %cst_27 {dimension_numbers = #tpu.dot_dimension_numbers<[1], [0], [0], [1], [0, 0, 1, 1], [], []>} : vector<8x128xbf16>, vector<128x128xbf16>, vector<8x128xf32> -> vector<8x128xf32>
    %59 = arith.addf %56, %58 : vector<8x128xf32>
    %60 = math.tanh %59 : vector<8x128xf32>
    %c8_i32 = arith.constant 8 : i32
    %c0_28 = arith.constant 0 : index
    %c0_29 = arith.constant 0 : index
    %61 = vector.load %arg7[%c0_28, %c0_29] : memref<8x128xf32, #tpu.memory_space<vmem>>, vector<8x128xf32>
    tpu.vector_store %arg7[%c0_28, %c0_29], %60 {strides = array<i32>} : memref<8x128xf32, #tpu.memory_space<vmem>>, vector<8x128xf32>,
    %c0_i32_30 = arith.constant 0 : i32
    %62 = arith.cmpi eq, %arg1, %c0_i32_30 : i32
    %63 = arith.extui %62 : i1 to i32
    %c0_i32_31 = arith.constant 0 : i32
    %64 = arith.cmpi ne, %63, %c0_i32_31 : i32
    scf.if %64 {
      %65 = arith.truncf %60 : vector<8x128xf32> to vector<8x128xbf16>
      %c0_32 = arith.constant 0 : index
      %c0_33 = arith.constant 0 : index
      %66 = vector.load %arg4[%c0_32, %c0_33] : memref<128x128xbf16, #tpu.memory_space<vmem>>, vector<128x128xbf16>
      %cst_34 = arith.constant dense<0.000000e+00> : vector<8x128xf32>
      %67 = tpu.matmul %65, %66, %cst_34 {dimension_numbers = #tpu.dot_dimension_numbers<[1], [0], [0], [1], [0, 0, 1, 1], [], []>} : vector<8x128xbf16>, vector<128x128xbf16>, vector<8x128xf32> -> vector<8x128xf32>
      %c0_35 = arith.constant 0 : index
      %c0_36 = arith.constant 0 : index
      %68 = vector.load %arg5[%c0_35, %c0_36] : memref<1x128xf32, #tpu.memory_space<vmem>>, vector<1x128xf32>
      %69 = vector.broadcast %68 : vector<1x128xf32> to vector<8x128xf32>
      %70 = arith.addf %67, %69 : vector<8x128xf32>
      %c0_37 = arith.constant 0 : index
      %c0_38 = arith.constant 0 : index
      %71 = vector.load %arg6[%c0_37, %c0_38] : memref<8x128xf32, #tpu.memory_space<vmem>>, vector<8x128xf32>
      tpu.vector_store %arg6[%c0_37, %c0_38], %70 {strides = array<i32>} : memref<8x128xf32, #tpu.memory_space<vmem>>, vector<8x128xf32>,
    } else {
    }
    return
  }
  func.func @transform_0(%arg0: i32, %arg1: i32) -> (i32, i32, i32) {
    %c0_i32 = arith.constant 0 : i32
    %c0_i32_0 = arith.constant 0 : i32
    return %arg1, %arg0, %c0_i32 : i32, i32, i32
  }
  func.func @transform_1(%arg0: i32, %arg1: i32) -> (i32, i32) {
    %c0_i32 = arith.constant 0 : i32
    %c0_i32_0 = arith.constant 0 : i32
    %c0_i32_1 = arith.constant 0 : i32
    return %c0_i32, %c0_i32_0 : i32, i32
  }
  func.func @transform_2(%arg0: i32, %arg1: i32) -> (i32, i32) {
    %c0_i32 = arith.constant 0 : i32
    %c0_i32_0 = arith.constant 0 : i32
    %c0_i32_1 = arith.constant 0 : i32
    return %c0_i32, %c0_i32_0 : i32, i32
  }
  func.func @transform_3(%arg0: i32, %arg1: i32) -> (i32, i32) {
    %c0_i32 = arith.constant 0 : i32
    %c0_i32_0 = arith.constant 0 : i32
    %c0_i32_1 = arith.constant 0 : i32
    return %c0_i32, %c0_i32_0 : i32, i32
  }
  func.func @transform_4(%arg0: i32, %arg1: i32) -> (i32, i32) {
    %c0_i32 = arith.constant 0 : i32
    %c0_i32_0 = arith.constant 0 : i32
    return %arg0, %c0_i32 : i32, i32
  }
}

</mosaic_0001>

<bundles_post_ra>
// kernel: tpu_custom_call.1
= control target key start
LH: loop header
LB: loop body
LE: loop exit
PB: predicated region body
PF: predicated region fallthrough
CT: control target
= control target key end

     0   :  { %9 = vsyncpa [#allocation4], 0  ;;  %s640_s0 = inlined_call_operand.hbm [shape: f32[8,8,128], index: 0, kind: input, shape index: {}]   ;;  %s641_s1 = inlined_call_operand.hbm [shape: bf16[128,128], index: 1, kind: input, shape index: {}]   ;;  %s642_s2 = inlined_call_operand.hbm [shape: bf16[128,128], index: 2, kind: input, shape index: {}]   ;;  %s643_s3 = inlined_call_operand.vmem [shape: f32[1,128], index: 3, kind: input, shape index: {}]   ;;  %s644_s4 = inlined_call_operand.hbm [shape: f32[8,128], index: 4, kind: output, shape index: {}]  }
   0x1   :  { %10 = vsyncpa [#allocation7], 0  ;;  %s29_s17 = sshll.u32 %s641_s1, 4  ;;  %s30_s17 = int_to_ptr.hbm [resolvable:$true] %s29_s17 }
   0x2   :  { %11 = vsyncpa [#allocation5], 0  ;;  %s591_s18 = smov [#allocation6]   ;;  %s16_s22 = sshll.u32 %s640_s0, 4  ;;  %s17_s22 = int_to_ptr.hbm [resolvable:$true] %s16_s22 }
   0x3   :  { %s31_s19 = sshll.u32 %s591_s18, 4  ;;  %s592_s23 = smov 64   ;;  %s32_s19 = int_to_ptr.vmem [resolvable:$true] %s31_s19 }
   0x4   :  { %s593_s24 = smov 4   ;;  %s594_s25 = smov [#allocation3]  }
   0x5   :  { %37 = dma.hbm_to_vmem [thread:$0]  %s30_s17, 1024, %s32_s19, [#allocation7], %s592_s23, %s592_s23, %s593_s24  }
   0x6   :  { %s18_s26 = sshll.u32 %s594_s25, 4  ;;  %s595_s27 = smov 128   ;;  %s19_s26 = int_to_ptr.vmem [resolvable:$true] %s18_s26 }
   0x7   :  { %s596_s28 = smov 8   ;;  %s42_s30 = sshll.u32 %s642_s2, 4  ;;  %s43_s30 = int_to_ptr.hbm [resolvable:$true] %s42_s30 }
   0x8   :  { %24 = dma.hbm_to_vmem [thread:$0]  %s17_s22, 1024, %s19_s26, [#allocation4], %s595_s27, %s595_s27, %s596_s28  }
   0x9   :  { %s597_s5 = smov [#allocation8]  }
   0xa   :  { %s44_s6 = sshll.u32 %s597_s5, 4  ;;  %s45_s6 = int_to_ptr.vmem [resolvable:$true] %s44_s6 }
   0xb   :  { %50 = dma.hbm_to_vmem [thread:$0]  %s43_s30, 1024, %s45_s6, [#allocation7], %s592_s23, %s592_s23, %s593_s24  }
   0xc   :  { %585 = dma.done.wait [#allocation4], 1024  }
   0xd   :  { %586 = vsyncadd [#allocation4], 4294966272 }
   0xe   :  { %587 = dma.done.wait [#allocation7], 2048  }
   0xf   :  { %588 = vsyncadd [#allocation7], 4294965248  ;;  %v454_v0 = vld [vmem:[#allocation6 + $0x38] sm:$0xff]  ;;  %v453_v1 = vld [vmem:[#allocation6 + $0x30] sm:$0xff]  ;;  %v598_v8 = vmov 0.0|0.0   ;;  %s599_s7 = smov [#allocation9]  }
  0x10   :  { %137 = vmatpush.bf16.msra.mxu0 %v454_v0  ;;  %155 = vmatpush.bf16.msra.mxu1 %v454_v0  ;;  %v452_v2 = vld [vmem:[#allocation6 + $0x28] sm:$0xff]  ;;  %v451_v3 = vld [vmem:[#allocation6 + $0x20] sm:$0xff]  ;;  %v450_v4 = vld [vmem:[#allocation6 + $0x18] sm:$0xff]  ;;  %s370_s8 = sshll.u32 %s599_s7, 4  ;;  %s372_s11 = sshll.u32 %s644_s4, 4  ;;  %s371_s8 = int_to_ptr.vmem [resolvable:$true] %s370_s8  ;;  %s373_s11 = int_to_ptr.hbm [resolvable:$true] %s372_s11 }
  0x11   :  { %173 = vmatpush.bf16.msra.mxu2 %v454_v0  ;;  %191 = vmatpush.bf16.msra.mxu3 %v454_v0  ;;  %v449_v5 = vld [vmem:[#allocation6 + $0x10] sm:$0xff]  ;;  %v448_v6 = vld [vmem:[#allocation6 + $0x8] sm:$0xff]  ;;  %v447_v7 = vld [vmem:[#allocation6] sm:$0xff] }
  0x12   :  { %v87_v9 = vld [vmem:[#allocation3] sm:$0xff]  ;;  %v153_v15 = vld [vmem:[#allocation3 + $0x8] sm:$0xff]  ;;  %v171_v21 = vld [vmem:[#allocation3 + $0x10] sm:$0xff] }
  0x13   :  { %v189_v27 = vld [vmem:[#allocation3 + $0x18] sm:$0xff]  ;;  %v207_v33 = vld [vmem:[#allocation3 + $0x20] sm:$0xff]  ;;  %v225_v39 = vld [vmem:[#allocation3 + $0x28] sm:$0xff] }
  0x14   :  { %138 = vmatpush.bf16.msra.mxu0 %v453_v1  ;;  %156 = vmatpush.bf16.msra.mxu1 %v453_v1  ;;  %v462_v45 = vld [vmem:[#allocation8 + $0x38] sm:$0xff]  ;;  %v461_v46 = vld [vmem:[#allocation8 + $0x30] sm:$0xff]  ;;  %v460_v47 = vld [vmem:[#allocation8 + $0x28] sm:$0xff] }
  0x15   :  { %174 = vmatpush.bf16.msra.mxu2 %v453_v1  ;;  %192 = vmatpush.bf16.msra.mxu3 %v453_v1  ;;  %v459_v48 = vld [vmem:[#allocation8 + $0x20] sm:$0xff]  ;;  %v458_v49 = vld [vmem:[#allocation8 + $0x18] sm:$0xff]  ;;  %v243_v50 = vld [vmem:[#allocation3 + $0x30] sm:$0xff] }
  0x16   :  { %v457_v56 = vld [vmem:[#allocation8 + $0x10] sm:$0xff]  ;;  %v456_v57 = vld [vmem:[#allocation8 + $0x8] sm:$0xff]  ;;  %v455_v58 = vld [vmem:[#allocation8] sm:$0xff] }
  0x17   :  { %v261_v59 = vld [vmem:[#allocation3 + $0x38] sm:$0xff] }
  0x18   :  { %139 = vmatpush.bf16.msra.mxu0 %v452_v2  ;;  %157 = vmatpush.bf16.msra.mxu1 %v452_v2 }
  0x19   :  { %175 = vmatpush.bf16.msra.mxu2 %v452_v2  ;;  %193 = vmatpush.bf16.msra.mxu3 %v452_v2 }
  0x1c   :  { %140 = vmatpush.bf16.msra.mxu0 %v451_v3  ;;  %158 = vmatpush.bf16.msra.mxu1 %v451_v3 }
  0x1d   :  { %176 = vmatpush.bf16.msra.mxu2 %v451_v3  ;;  %194 = vmatpush.bf16.msra.mxu3 %v451_v3 }
  0x20   :  { %141 = vmatpush.bf16.msra.mxu0 %v450_v4  ;;  %159 = vmatpush.bf16.msra.mxu1 %v450_v4 }
  0x21   :  { %177 = vmatpush.bf16.msra.mxu2 %v450_v4  ;;  %195 = vmatpush.bf16.msra.mxu3 %v450_v4 }
  0x24   :  { %142 = vmatpush.bf16.msra.mxu0 %v449_v5  ;;  %160 = vmatpush.bf16.msra.mxu1 %v449_v5 }
  0x25   :  { %178 = vmatpush.bf16.msra.mxu2 %v449_v5  ;;  %196 = vmatpush.bf16.msra.mxu3 %v449_v5 }
  0x28   :  { %143 = vmatpush.bf16.msra.mxu0 %v448_v6  ;;  %161 = vmatpush.bf16.msra.mxu1 %v448_v6 }
  0x29   :  { %179 = vmatpush.bf16.msra.mxu2 %v448_v6  ;;  %197 = vmatpush.bf16.msra.mxu3 %v448_v6 }
  0x2c   :  { %144 = vmatpush.bf16.msra.mxu0 %v447_v7  ;;  %162 = vmatpush.bf16.msra.mxu1 %v447_v7 }
  0x2d   :  { %180 = vmatpush.bf16.msra.mxu2 %v447_v7  ;;  %198 = vmatpush.bf16.msra.mxu3 %v447_v7 }
  0x2f   :  { %145 = vmatmul.bf16.vlgmr.msra.gmra.mxu0 %v598_v8 }
  0x30   :  { %209 = vmatpush.bf16.msrb.mxu0 %v454_v0  ;;  %227 = vmatpush.bf16.msrb.mxu1 %v454_v0 }
  0x31   :  { %245 = vmatpush.bf16.msrb.mxu2 %v454_v0  ;;  %263 = vmatpush.bf16.msrb.mxu3 %v454_v0 }
  0x34   :  { %210 = vmatpush.bf16.msrb.mxu0 %v453_v1  ;;  %228 = vmatpush.bf16.msrb.mxu1 %v453_v1 }
  0x35   :  { %246 = vmatpush.bf16.msrb.mxu2 %v453_v1  ;;  %264 = vmatpush.bf16.msrb.mxu3 %v453_v1  ;;  %v472_v1 = vld [vmem:[%s643_s3] ss:$0 sm:$0xff] }
  0x38   :  { %211 = vmatpush.bf16.msrb.mxu0 %v452_v2  ;;  %229 = vmatpush.bf16.msrb.mxu1 %v452_v2 }
  0x39   :  { %247 = vmatpush.bf16.msrb.mxu2 %v452_v2  ;;  %265 = vmatpush.bf16.msrb.mxu3 %v452_v2 }
  0x3c   :  { %212 = vmatpush.bf16.msrb.mxu0 %v451_v3  ;;  %230 = vmatpush.bf16.msrb.mxu1 %v451_v3 }
  0x3d   :  { %248 = vmatpush.bf16.msrb.mxu2 %v451_v3  ;;  %266 = vmatpush.bf16.msrb.mxu3 %v451_v3 }
  0x40   :  { %213 = vmatpush.bf16.msrb.mxu0 %v450_v4  ;;  %231 = vmatpush.bf16.msrb.mxu1 %v450_v4 }
  0x41   :  { %249 = vmatpush.bf16.msrb.mxu2 %v450_v4  ;;  %267 = vmatpush.bf16.msrb.mxu3 %v450_v4 }
  0x44   :  { %214 = vmatpush.bf16.msrb.mxu0 %v449_v5  ;;  %232 = vmatpush.bf16.msrb.mxu1 %v449_v5 }
  0x45   :  { %250 = vmatpush.bf16.msrb.mxu2 %v449_v5  ;;  %268 = vmatpush.bf16.msrb.mxu3 %v449_v5 }
  0x48   :  { %215 = vmatpush.bf16.msrb.mxu0 %v448_v6  ;;  %233 = vmatpush.bf16.msrb.mxu1 %v448_v6 }
  0x49   :  { %251 = vmatpush.bf16.msrb.mxu2 %v448_v6  ;;  %269 = vmatpush.bf16.msrb.mxu3 %v448_v6 }
  0x4c   :  { %216 = vmatpush.bf16.msrb.mxu0 %v447_v7  ;;  %234 = vmatpush.bf16.msrb.mxu1 %v447_v7 }
  0x4d   :  { %252 = vmatpush.bf16.msrb.mxu2 %v447_v7  ;;  %270 = vmatpush.bf16.msrb.mxu3 %v447_v7 }
  0x50   :  { %351 = vmatpush.bf16.msra.mxu0 %v462_v45 }
  0x54   :  { %352 = vmatpush.bf16.msra.mxu0 %v461_v46 }
  0x58   :  { %353 = vmatpush.bf16.msra.mxu0 %v460_v47 }
  0x5c   :  { %354 = vmatpush.bf16.msra.mxu0 %v459_v48 }
  0x60   :  { %355 = vmatpush.bf16.msra.mxu0 %v458_v49 }
  0x64   :  { %356 = vmatpush.bf16.msra.mxu0 %v457_v56 }
  0x68   :  { %357 = vmatpush.bf16.msra.mxu0 %v456_v57 }
  0x6c   :  { %358 = vmatpush.bf16.msra.mxu0 %v455_v58 }
  0xac   :  { %v146_v10 = vpop.f32.mrf.mxu0 }
  0xad   :  { %v150_v11 = vadd.f32 %v146_v10, %v87_v9 }
  0xaf   :  { %473 = vtanh.f32 %v150_v11 }
  0xb4   :  { %v148_v12 = vpop.f32.mrf.mxu0 }
  0xb5   :  { %v474_v13 = vpop.eup %473 }
  0xb6   :  { %v154_v14 = vpack.c.bf16 %v474_v13, %v474_v13 }
  0xb8   :  { %163 = vmatmul.bf16.vlgmr.msra.gmra.mxu1 %v154_v14 }
 0x135   :  { %v164_v16 = vpop.f32.mrf.mxu1 }
 0x136   :  { %v168_v17 = vadd.f32 %v164_v16, %v153_v15 }
 0x138   :  { %475 = vtanh.f32 %v168_v17 }
 0x13d   :  { %v166_v18 = vpop.f32.mrf.mxu1 }
 0x13e   :  { %v476_v19 = vpop.eup %475 }
 0x13f   :  { %v172_v20 = vpack.c.bf16 %v476_v19, %v476_v19 }
 0x141   :  { %181 = vmatmul.bf16.vlgmr.msra.gmra.mxu2 %v172_v20 }
 0x1c4   :  { %v182_v22 = vpop.f32.mrf.mxu2 }
 0x1c5   :  { %v186_v23 = vadd.f32 %v182_v22, %v171_v21 }
 0x1c7   :  { %477 = vtanh.f32 %v186_v23 }
 0x1cc   :  { %v184_v24 = vpop.f32.mrf.mxu2 }
 0x1cd   :  { %v478_v25 = vpop.eup %477 }
 0x1ce   :  { %v190_v26 = vpack.c.bf16 %v478_v25, %v478_v25 }
 0x1d0   :  { %199 = vmatmul.bf16.vlgmr.msra.gmra.mxu3 %v190_v26 }
 0x253   :  { %v200_v28 = vpop.f32.mrf.mxu3 }
 0x254   :  { %v204_v29 = vadd.f32 %v200_v28, %v189_v27 }
 0x256   :  { %479 = vtanh.f32 %v204_v29 }
 0x25b   :  { %v202_v30 = vpop.f32.mrf.mxu3 }
 0x25c   :  { %v480_v31 = vpop.eup %479 }
 0x25d   :  { %v208_v32 = vpack.c.bf16 %v480_v31, %v480_v31 }
 0x25f   :  { %217 = vmatmul.bf16.vlgmr.msrb.gmra.mxu0 %v208_v32 }
 0x2dc   :  { %v218_v34 = vpop.f32.mrf.mxu0 }
 0x2dd   :  { %v222_v35 = vadd.f32 %v218_v34, %v207_v33 }
 0x2df   :  { %481 = vtanh.f32 %v222_v35 }
 0x2e4   :  { %v220_v36 = vpop.f32.mrf.mxu0 }
 0x2e5   :  { %v482_v37 = vpop.eup %481 }
 0x2e6   :  { %v226_v38 = vpack.c.bf16 %v482_v37, %v482_v37 }
 0x2e8   :  { %235 = vmatmul.bf16.vlgmr.msrb.gmra.mxu1 %v226_v38 }
 0x365   :  { %v236_v40 = vpop.f32.mrf.mxu1 }
 0x366   :  { %v240_v41 = vadd.f32 %v236_v40, %v225_v39 }
 0x368   :  { %483 = vtanh.f32 %v240_v41 }
 0x36d   :  { %v238_v42 = vpop.f32.mrf.mxu1 }
 0x36e   :  { %v484_v43 = vpop.eup %483 }
 0x36f   :  { %v244_v44 = vpack.c.bf16 %v484_v43, %v484_v43 }
 0x371   :  { %253 = vmatmul.bf16.vlgmr.msrb.gmra.mxu2 %v244_v44 }
 0x3f4   :  { %v254_v51 = vpop.f32.mrf.mxu2 }
 0x3f5   :  { %v258_v52 = vadd.f32 %v254_v51, %v243_v50 }
 0x3f7   :  { %485 = vtanh.f32 %v258_v52 }
 0x3fc   :  { %v256_v53 = vpop.f32.mrf.mxu2 }
 0x3fd   :  { %v486_v54 = vpop.eup %485 }
 0x3fe   :  { %v262_v55 = vpack.c.bf16 %v486_v54, %v486_v54 }
 0x400   :  { %271 = vmatmul.bf16.vlgmr.msrb.gmra.mxu3 %v262_v55 }
 0x483   :  { %v272_v60 = vpop.f32.mrf.mxu3 }
 0x484   :  { %v276_v61 = vadd.f32 %v272_v60, %v261_v59 }
 0x486   :  { %487 = vtanh.f32 %v276_v61 }
 0x48b   :  { %v274_v62 = vpop.f32.mrf.mxu3 }
 0x48c   :  { %v488_v63 = vpop.eup %487 }
 0x48d   :  { %v282_v0 = vpack.c.bf16 %v488_v63, %v488_v63 }
 0x48f   :  { %359 = vmatmul.bf16.vlgmr.msra.gmra.mxu0 %v282_v0 }
 0x50c   :  { %v360_v2 = vpop.f32.mrf.mxu0 }
 0x50d   :  { %v361_v3 = vadd.f32 %v472_v1, %v360_v2 }
 0x50f   :  { %364 = vst [vmem:[#allocation9] sm:$0xff] %v361_v3 }
 0x510   :  { %375 = dma.vmem_to_hbm [thread:$0]  %s371_s8, 128, %s373_s11, [#allocation5]  }
 0x514   :  { %v362_v4 = vpop.f32.mrf.mxu0 }
 0x515   :  { %589 = dma.done.wait [#allocation5], 128  }
 0x516   :  { %590 = vsyncadd [#allocation5], 4294967168 }
 0x517   :  { %380 = vsyncpa [#allocation4], 1 }
 0x518   :  { %381 = vsyncpa [#allocation7], 1 }
 0x519   :  { %382 = vsyncpa [#allocation5], 1 }

</bundles_post_ra>
